<compile_context>
chip_gen: v7x
topology: tpu7x:2x2x1
jax: 0.10.0
libtpu: 0.0.40
codegen_flags: <defaults>
</compile_context>

<pallas_src>
import functools

import jax
import jax.numpy as jnp
import numpy as np
from jax import lax
from jax.experimental import pallas as pl
from jax.experimental.pallas import tpu as pltpu


def _round_up(x, m):
    return ((x + m - 1) // m) * m


def _sublane_multiple(dtype):
    # Packed sublane multiple: f32 -> 8, bf16 -> 16, int8/fp8 -> 32.
    itemsize = jnp.dtype(dtype).itemsize
    return max(8, 32 // int(itemsize))


def _vmem_capacity_bytes():
    # Generation-aware budget: 64 MiB/TC on v7x, 128 MiB on v5e/v6e.
    # Conservative fallback (treat unknown as v7x-like) so we never over-ask.
    try:
        return int(pltpu.get_tpu_info().vmem_capacity_bytes)
    except Exception:
        return 64 << 20


def _pca_stats_kernel(x_ref, gram_ref, colsum_ref, *, tile_d, full_d):
    """Grid = (D_pad // tile_d, N_pad // tile_n).

    Axis 0 (j): gram column stripe — "parallel" (sharded across TCs on v7x).
    Axis 1 (i): batch tile — the reduction axis, kept last ("arbitrary").
    Outputs are resident accumulators across i (constant block index).
    """
    j = pl.program_id(0)
    i = pl.program_id(1)

    @pl.when(i == 0)
    def _init():
        gram_ref[...] = jnp.zeros_like(gram_ref)
        colsum_ref[...] = jnp.zeros_like(colsum_ref)

    x = x_ref[...]                                    # (tile_n, D_pad), native dtype
    if tile_d == full_d:
        xc = x                                        # no column tiling
    else:
        col = pl.multiple_of(j * tile_d, tile_d)      # 128-aligned lane offset
        xc = x_ref[:, pl.ds(col, tile_d)]             # (tile_n, tile_d) slab

    # x^T @ xc expressed as a contraction over the batch axis: no explicit
    # transpose and no f32 pre-cast — the MXU takes bf16/f32 natively and
    # accumulates in f32.
    gram_ref[...] += lax.dot_general(
        x, xc,
        dimension_numbers=(((0,), (0,)), ((), ())),
        preferred_element_type=jnp.float32)

    # Column sums (VPU reduction, f32 accumulation).
    colsum_ref[...] += jnp.sum(xc.astype(jnp.float32), axis=0, keepdims=True)


def pca_stats(x, *, tile_n=None, tile_d=None):
    """Compute (gram, colsum) = (x^T @ x, x.sum(axis=0)) with a Pallas kernel.

    Returns f32 results of shape (D, D) and (D,).  x is not copied — the
    layer's forward output is x itself.
    """
    n, d = x.shape
    itemsize = int(jnp.dtype(x.dtype).itemsize)

    # --- Lane-dense D: pad to a multiple of 128 with zero columns (zero
    #     columns/rows contribute nothing to the gram or the column sums);
    #     the result is sliced back to (d, d) / (d,) after the call.
    d_pad = _round_up(d, 128)

    # --- Batch tile: larger in the memory-bound small/medium-D regime so the
    #     per-grid-step overhead and gram RMW traffic are amortized; rounded
    #     to the dtype's packed sublane multiple (16 for bf16, 32 for int8).
    sub = _sublane_multiple(x.dtype)
    if tile_n is None:
        if d_pad <= 512:
            tile_n = 1024
        elif d_pad <= 2048:
            tile_n = 512
        else:
            tile_n = 256
    tile_n = max(sub, min(int(tile_n), _round_up(n, sub)))
    tile_n = _round_up(tile_n, sub)
    n_pad = _round_up(n, tile_n)

    if n_pad != n or d_pad != d:
        # Zero rows/columns are exact no-ops for x^T x and column sums.
        x = jnp.pad(x, ((0, n_pad - n), (0, d_pad - d)))

    # --- Generation-aware VMEM budgets.
    vmem_cap = _vmem_capacity_bytes()
    v7x_like = vmem_cap <= (72 << 20)
    if v7x_like:
        sel_budget = max(16 << 20, min(48 << 20, vmem_cap - (16 << 20)))
        vmem_cap_limit = max(24 << 20, min(56 << 20, vmem_cap - (8 << 20)))
    else:
        sel_budget = 96 << 20
        vmem_cap_limit = 108 << 20

    # Double-buffered input tile + resident gram stripe (+ colsum), all in
    # VMEM at once.
    x_tile_bytes = 2 * tile_n * d_pad * itemsize

    def _fits(t):
        return 2 * d_pad * t * 4 + 2 * t * 4 + x_tile_bytes <= sel_budget

    # --- Gram column tiling.
    if tile_d is None:
        # v7x has 2 TensorCores: guarantee >= 2 blocks on the parallel j axis
        # whenever D allows, so the grid can be sharded across both cores
        # (costs nothing on single-TC v5e/v6e, which never hit this branch).
        force_split = v7x_like and d_pad >= 256
        limit = d_pad // 2 if force_split else d_pad
        candidates = [t for t in range(128, d_pad + 1, 128)
                      if d_pad % t == 0 and t <= limit and _fits(t)]
        tile_d = max(candidates) if candidates else 128
    tile_d = int(tile_d)
    assert d_pad % tile_d == 0, (d_pad, tile_d)

    num_dj = d_pad // tile_d
    num_ni = n_pad // tile_n
    grid = (num_dj, num_ni)

    kernel = functools.partial(_pca_stats_kernel, tile_d=tile_d, full_d=d_pad)

    grid_spec = pltpu.PrefetchScalarGridSpec(
        num_scalar_prefetch=0,
        grid=grid,
        in_specs=[
            pl.BlockSpec((tile_n, d_pad), lambda j, i: (i, 0)),
        ],
        out_specs=[
            # Resident accumulators: block index ignores the reduction axis i.
            pl.BlockSpec((d_pad, tile_d), lambda j, i: (0, j)),
            pl.BlockSpec((1, tile_d), lambda j, i: (0, j)),
        ],
    )

    footprint = (2 * tile_n * d_pad * itemsize
                 + 2 * d_pad * tile_d * 4
                 + 2 * tile_d * 4)
    vmem_limit = int(min(footprint + (8 << 20), vmem_cap_limit))
    vmem_limit = int(max(vmem_limit, 16 << 20))

    cost = pl.CostEstimate(
        flops=2 * n_pad * d_pad * d_pad,
        transcendentals=0,
        bytes_accessed=(num_dj * n_pad * d_pad * itemsize
                        + d_pad * d_pad * 4 + d_pad * 4),
    )

    gram, colsum = pl.pallas_call(
        kernel,
        out_shape=(
            jax.ShapeDtypeStruct((d_pad, d_pad), jnp.float32),
            jax.ShapeDtypeStruct((1, d_pad), jnp.float32),
        ),
        grid_spec=grid_spec,
        compiler_params=pltpu.CompilerParams(
            dimension_semantics=("parallel", "arbitrary"),
            vmem_limit_bytes=vmem_limit,
        ),
        cost_estimate=cost,
    )(x)

    if d_pad != d:
        gram = gram[:d, :d]
        colsum = colsum[:, :d]
    return gram, colsum[0]


class LinearPCALayerJAX:
    """Minimal JAX mirror of LinearPCALayer (forward semantics only)."""

    def __init__(self, in_features, threshold=0.99, keepdim=True,
                 gradient_epoch_start=5, centering=True):
        self.in_features = in_features
        self.threshold = np.float64(threshold)
        self.keepdim = keepdim
        self.centering = centering
        self.gradient_epoch = gradient_epoch_start
        self.epoch = 0
        self.training = True
        self.pca_computed = True
        # Device-side f32 accumulators: updated every forward on the TPU
        # (no per-step D x D PCIe transfer / host numpy f64 add).  The TPU has
        # no f64 MXU/VPU path, so within-run accumulation is f32; the host f64
        # mirrors (matching the PyTorch buffers) are refreshed lazily.
        self.sum_squares_dev = jnp.zeros((in_features, in_features), jnp.float32)
        self.running_sum_dev = jnp.zeros((in_features,), jnp.float32)
        self._seen = 0.0
        # Host float64 mirrors of the PyTorch buffers.
        self.eigenvalues = np.zeros((in_features,), np.float64)
        self.eigenvectors = np.zeros((in_features, in_features), np.float64)
        self.sum_squares = np.zeros((in_features, in_features), np.float64)
        self.seen_samples = np.zeros((1,), np.float64)
        self.running_sum = np.zeros((in_features,), np.float64)
        self.mean = np.zeros((in_features,), np.float32)

    def forward(self, x):
        if self.training:
            self.pca_computed = False
            # _update_autorcorrelation: hot path inside the Pallas kernel.
            gram, colsum = pca_stats(x)
            # On-device accumulation (stays in f32 on the TPU between syncs).
            self.sum_squares_dev = self.sum_squares_dev + gram
            self.running_sum_dev = self.running_sum_dev + colsum
            self._seen += float(x.shape[0])
        else:
            # TODO(synk): eval-side _compute_eigenspace/_compute_pca_matrix
            # (symeig on the f64 autocorrelation) is offline host bookkeeping,
            # not kernelized.
            pass
        # LinearPCALayerFunction.forward: the projection branch is disabled
        # (`and False`), so the output is always x itself — no copy needed.
        return x

    def sync_to_host(self):
        """Refresh the float64 host buffers (call every K steps, not per step)."""
        self.sum_squares = np.asarray(self.sum_squares_dev, dtype=np.float64)
        self.running_sum = np.asarray(self.running_sum_dev, dtype=np.float64)
        self.seen_samples = np.array([self._seen], dtype=np.float64)
        return self.sum_squares, self.running_sum, self.seen_samples


if __name__ == "__main__":
    key = jax.random.PRNGKey(0)

    def check(n, d, dtype, tile_d=None, rtol=1e-4, atol=1e-4):
        k = jax.random.fold_in(key, n * 1000 + d)
        x = jax.random.normal(k, (n, d), dtype=jnp.float32).astype(dtype)
        gram, colsum = pca_stats(x, tile_d=tile_d)
        gram = jax.block_until_ready(gram)
        colsum = jax.block_until_ready(colsum)
        assert gram.shape == (d, d) and colsum.shape == (d,), (gram.shape, colsum.shape)
        xf = x.astype(jnp.float32)
        ref_gram = xf.T @ xf
        ref_sum = xf.sum(axis=0)
        assert jnp.allclose(gram, ref_gram, rtol=rtol, atol=atol), (n, d, dtype)
        assert jnp.allclose(colsum, ref_sum, rtol=rtol, atol=atol), (n, d, dtype)

    # 1) f32, ragged batch (zero-pad remainder path).
    check(50, 128, jnp.float32)
    # 2) f32, gram-column-tiled path (tile_d < D, two-axis grid, parallel j).
    check(300, 256, jnp.float32, tile_d=128)
    # 3) bf16 fed natively to the MXU with f32 accumulation.
    check(64, 128, jnp.bfloat16, rtol=2e-2, atol=5e-1)
    # 4) bf16 ragged batch -> tile_n rounded to the 16-row packed sublane.
    check(50, 128, jnp.bfloat16, rtol=2e-2, atol=5e-1)
    # 5) D not a multiple of 128 -> zero-column padding + host-side slice.
    check(40, 96, jnp.float32)

    # Layer-level check: forward is identity + on-device statistics accumulation.
    D = 128
    layer = LinearPCALayerJAX(in_features=D)
    x1 = jax.random.normal(jax.random.fold_in(key, 1), (48, D), dtype=jnp.float32)
    x2 = jax.random.normal(jax.random.fold_in(key, 2), (16, D), dtype=jnp.float32)
    y1 = layer.forward(x1)
    assert y1 is x1, "forward must return x unchanged (no copy)"
    y2 = layer.forward(x2)
    assert y2 is x2, "forward must return x unchanged (no copy)"
    jax.block_until_ready(layer.sum_squares_dev)

    ss, rs, seen = layer.sync_to_host()
    x_all = np.concatenate(
        [np.asarray(x1, dtype=np.float64), np.asarray(x2, dtype=np.float64)], axis=0)
    ref_gram = x_all.T @ x_all
    ref_sum = x_all.sum(axis=0)
    assert np.allclose(ss, ref_gram, rtol=1e-3, atol=1e-3)
    assert np.allclose(rs, ref_sum, rtol=1e-3, atol=1e-3)
    assert float(seen[0]) == 64.0

    print("KERNEL_OK")
</pallas_src>

<mosaic_0001>
module attributes {stable_mosaic.version = 11 : i64} {
  func.func @_pca_stats_kernel(%arg0: i32, %arg1: i32, %arg2: memref<56x128xf32, #tpu.memory_space<vmem>>, %arg3: memref<128x128xf32, #tpu.memory_space<vmem>>, %arg4: memref<1x128xf32, #tpu.memory_space<vmem>>) attributes {dimension_semantics = [#tpu.dimension_semantics<parallel>, #tpu.dimension_semantics<arbitrary>], iteration_bounds = array<i64: 1, 1>, scalar_prefetch = 0 : i64, scratch_operands = 0 : i64, tpu.core_type = #tpu.core_type<tc>, window_params = [{transform_indices = @transform_0, window_bounds = array<i64: 56, 128>}, {transform_indices = @transform_1, window_bounds = array<i64: 128, 128>}, {transform_indices = @transform_2, window_bounds = array<i64: 1, 128>}]} {
    %c0_i32 = arith.constant 0 : i32
    %0 = arith.cmpi eq, %arg1, %c0_i32 : i32
    %1 = arith.extui %0 : i1 to i32
    %c0_i32_0 = arith.constant 0 : i32
    %2 = arith.cmpi ne, %1, %c0_i32_0 : i32
    scf.if %2 {
      %cst_11 = arith.constant 0.000000e+00 : f32
      %13 = vector.broadcast %cst_11 : f32 to vector<128x128xf32>
      %c0_12 = arith.constant 0 : index
      %c0_13 = arith.constant 0 : index
      %14 = vector.load %arg3[%c0_12, %c0_13] : memref<128x128xf32, #tpu.memory_space<vmem>>, vector<128x128xf32>
      tpu.vector_store %arg3[%c0_12, %c0_13], %13 {strides = array<i32>} : memref<128x128xf32, #tpu.memory_space<vmem>>, vector<128x128xf32>,
      %cst_14 = arith.constant 0.000000e+00 : f32
      %15 = vector.broadcast %cst_14 : f32 to vector<1x128xf32>
      %c0_15 = arith.constant 0 : index
      %c0_16 = arith.constant 0 : index
      %16 = vector.load %arg4[%c0_15, %c0_16] : memref<1x128xf32, #tpu.memory_space<vmem>>, vector<1x128xf32>
      tpu.vector_store %arg4[%c0_15, %c0_16], %15 {strides = array<i32>} : memref<1x128xf32, #tpu.memory_space<vmem>>, vector<1x128xf32>,
    } else {
    }
    %c0 = arith.constant 0 : index
    %c0_1 = arith.constant 0 : index
    %3 = vector.load %arg2[%c0, %c0_1] : memref<56x128xf32, #tpu.memory_space<vmem>>, vector<56x128xf32>
    %c0_2 = arith.constant 0 : index
    %c0_3 = arith.constant 0 : index
    %4 = vector.load %arg3[%c0_2, %c0_3] : memref<128x128xf32, #tpu.memory_space<vmem>>, vector<128x128xf32>
    %cst = arith.constant dense<0.000000e+00> : vector<128x128xf32>
    %5 = tpu.matmul %3, %3, %cst {dimension_numbers = #tpu.dot_dimension_numbers<[0], [0], [1], [1], [0, 1, 1, 1], [], []>} : vector<56x128xf32>, vector<56x128xf32>, vector<128x128xf32> -> vector<128x128xf32>
    %6 = arith.addf %4, %5 : vector<128x128xf32>
    %c0_4 = arith.constant 0 : index
    %c0_5 = arith.constant 0 : index
    %7 = vector.load %arg3[%c0_4, %c0_5] : memref<128x128xf32, #tpu.memory_space<vmem>>, vector<128x128xf32>
    tpu.vector_store %arg3[%c0_4, %c0_5], %6 {strides = array<i32>} : memref<128x128xf32, #tpu.memory_space<vmem>>, vector<128x128xf32>,
    %c0_6 = arith.constant 0 : index
    %c0_7 = arith.constant 0 : index
    %8 = vector.load %arg4[%c0_6, %c0_7] : memref<1x128xf32, #tpu.memory_space<vmem>>, vector<1x128xf32>
    %cst_8 = arith.constant dense<0.000000e+00> : vector<128xf32>
    %9 = vector.multi_reduction <add>, %3, %cst_8 [0] : vector<56x128xf32> to vector<128xf32>
    %10 = vector.shape_cast %9 : vector<128xf32> to vector<1x128xf32>
    %11 = arith.addf %8, %10 : vector<1x128xf32>
    %c0_9 = arith.constant 0 : index
    %c0_10 = arith.constant 0 : index
    %12 = vector.load %arg4[%c0_9, %c0_10] : memref<1x128xf32, #tpu.memory_space<vmem>>, vector<1x128xf32>
    tpu.vector_store %arg4[%c0_9, %c0_10], %11 {strides = array<i32>} : memref<1x128xf32, #tpu.memory_space<vmem>>, vector<1x128xf32>,
    return
  }
  func.func @transform_0(%arg0: i32, %arg1: i32) -> (i32, i32) {
    %c0_i32 = arith.constant 0 : i32
    %c0_i32_0 = arith.constant 0 : i32
    return %arg1, %c0_i32 : i32, i32
  }
  func.func @transform_1(%arg0: i32, %arg1: i32) -> (i32, i32) {
    %c0_i32 = arith.constant 0 : i32
    %c0_i32_0 = arith.constant 0 : i32
    return %c0_i32, %arg0 : i32, i32
  }
  func.func @transform_2(%arg0: i32, %arg1: i32) -> (i32, i32) {
    %c0_i32 = arith.constant 0 : i32
    %c0_i32_0 = arith.constant 0 : i32
    return %c0_i32, %arg0 : i32, i32
  }
}

</mosaic_0001>

<bundles_post_ra>
// kernel: tpu_custom_call.1
= control target key start
LH: loop header
LB: loop body
LE: loop exit
PB: predicated region body
PF: predicated region fallthrough
CT: control target
= control target key end

     0   :  { %8 = vsyncpa [#allocation3], 0  ;;  %s628_s0 = inlined_call_operand.hbm [shape: f32[56,128], index: 0, kind: input, shape index: {}]   ;;  %s629_s1 = inlined_call_operand.hbm [shape: f32[128,128], index: 1, kind: output, shape index: {0}]   ;;  %s630_s2 = inlined_call_operand.hbm [shape: f32[1,128], index: 2, kind: output, shape index: {1}]  }
   0x1   :  { %9 = vsyncpa [#allocation4], 0 }
   0x2   :  { %10 = vsyncpa [#allocation7], 0  ;;  %s549_s9 = smov [#allocation2]   ;;  %s477_s13 = scalar_lea.hbm %s628_s0, 896 }
   0x3   :  { %s16_s10 = sshll.u32 %s549_s9, 4  ;;  %p478_p0 = scmp.ne.s32.totalorder %s628_s0, %s477_s13  ;;  %s17_s10 = int_to_ptr.vmem [resolvable:$true] %s16_s10 }
   0x4   :  { %p481_p1 = scmp.lt.u32.totalorder %s477_s13, %s628_s0 }
   0x6   :  { %p483_p2 = pnand %p481_p1, %p478_p0 }
   0x8   :  { %486 = shalt.err (!%p483_p2)
}
   0x9   :  { %s487_s18 = scalar_lea.vmem %s17_s10, 896  ;;  %p492_p4 = scmp.lt.s32.totalorder %s17_s10, %s17_s10 }
   0xa   :  { %p488_p3 = scmp.ne.s32.totalorder %s17_s10, %s487_s18  ;;  %p493_p5 = scmp.lt.s32.totalorder %s487_s18, %s487_s18 }
   0xc   :  { %p494_p6 = por %p493_p5, %p492_p4 }
   0xe   :  { %p495_p7 = pnand %p494_p6, %p488_p3 }
  0x10   :  { %498 = shalt.err (!%p495_p7)
}
  0x11   :  { %s550_s19 = smov 128   ;;  %s551_s20 = smov 8  }
  0x12   :  { %22 = dma.hbm_to_vmem [thread:$0]  %s628_s0, 896, %s17_s10, [#allocation3], %s550_s19, %s550_s19, %s551_s20  }
  0x13   :  { %543 = dma.done.wait [#allocation3], 896  }
  0x14   :  { %544 = vsyncadd [#allocation3], 4294966400  ;;  %v47_v0 = vld [vmem:[#allocation2] sm:$0xff]  ;;  %v48_v1 = vld [vmem:[#allocation2 + $0x8] sm:$0xff]  ;;  %v552_v16 = vmov 0.0   ;;  %vm102_vm0 = vcmask 457728  }
  0x15   :  { %70 = vxpose.xlu0.b32.start [1/7] (short) %v47_v0, 128  ;;  %v451_v2 = vpack.c.bf16 %v48_v1, %v47_v0  ;;  %v329_v3 = vadd.f32 %v48_v1, %v47_v0  ;;  %v49_v4 = vld [vmem:[#allocation2 + $0x10] sm:$0xff]  ;;  %v50_v5 = vld [vmem:[#allocation2 + $0x18] sm:$0xff]  ;;  %v51_v8 = vld [vmem:[#allocation2 + $0x20] sm:$0xff]  ;;  %46 = vst [vmem:[#allocation6] sm:$0x1] %v552_v16  ;;  %s553_s0 = smov [#allocation6]  }
  0x16   :  { %v455_v6 = vpack.c.bf16 %v50_v5, %v49_v4  ;;  %v52_v9 = vld [vmem:[#allocation2 + $0x28] sm:$0xff]  ;;  %v53_v14 = vld [vmem:[#allocation2 + $0x30] sm:$0xff]  ;;  %s361_s23 = sshll.u32 %s553_s0, 4  ;;  %s362_s23 = int_to_ptr.vmem [resolvable:$true] %s361_s23 }
  0x17   :  { %v330_v7 = vadd.f32 %v329_v3, %v49_v4  ;;  %452 = vmatprep.subr.bf16.mxu0 %v451_v2  ;;  %463 = vmatprep.subr.bf16.mxu1 %v451_v2  ;;  %v459_v11 = vpack.c.bf16 %v52_v9, %v51_v8  ;;  %s499_s24 = scalar_lea.vmem %s362_s23, 16  ;;  %s503_s25 = scalar_lea.vmem %s362_s23, 32 }
  0x18   :  { %454 = vmatpush3.bf16.msra.mxu0 %v451_v2  ;;  %467 = vmatpush3.bf16.msra.mxu1 %v451_v2  ;;  %p500_p8 = scmp.ne.s32.totalorder %s362_s23, %s499_s24  ;;  %p504_p9 = scmp.lt.s32.totalorder %s362_s23, %s362_s23 }
  0x19   :  { %71 = vxpose.xlu0.b32.cont [2/7] (short) %v48_v1, 128  ;;  %v331_v10 = vadd.f32 %v330_v7, %v50_v5  ;;  %456 = vmatprep.subr.bf16.mxu0 %v455_v6  ;;  %p505_p10 = scmp.lt.s32.totalorder %s503_s25, %s499_s24 }
  0x1a   :  { %464 = vmatprep.subr.bf16.mxu1 %v455_v6 }
  0x1b   :  { %v332_v12 = vadd.f32 %v331_v10, %v51_v8  ;;  %p506_p11 = por %p505_p10, %p504_p9 }
  0x1c   :  { %458 = vmatpush3.bf16.msra.mxu0 %v455_v6  ;;  %468 = vmatpush3.bf16.msra.mxu1 %v455_v6  ;;  %v328_v39 = vld [vmem:[#allocation6] sm:$0x1] }
  0x1d   :  { %72 = vxpose.xlu0.b32.cont [3/7] (short) %v49_v4, 128  ;;  %v333_v13 = vadd.f32 %v332_v12, %v52_v9  ;;  %460 = vmatprep.subr.bf16.mxu0 %v459_v11  ;;  %p507_p12 = pnand %p506_p11, %p500_p8 }
  0x1e   :  { %465 = vmatprep.subr.bf16.mxu1 %v459_v11 }
  0x1f   :  { %v334_v15 = vadd.f32 %v333_v13, %v53_v14 }
  0x20   :  { %462 = vmatpush3.bf16.msra.mxu0 %v459_v11  ;;  %469 = vmatpush3.bf16.msra.mxu1 %v459_v11 }
  0x21   :  { %73 = vxpose.xlu0.b32.cont [4/7] (short) %v50_v5, 128  ;;  %425 = vmatprep.subr.mxu0 %v53_v14  ;;  %v335_v33 = vrot.slane %v334_v15, 4 }
  0x22   :  { %466 = vmatprep.subr.mxu1 %v53_v14 }
  0x23   :  { %v336_v34 = vadd.f32 %v335_v33, %v334_v15 }
  0x24   :  { %426 = vmatpush3.msra.mxu0 %v53_v14  ;;  %470 = vmatpush3.msra.mxu1 %v53_v14 }
  0x25   :  { %74 = vxpose.xlu0.b32.cont [5/7] (short) %v51_v8, 128  ;;  %v337_v35 = vrot.slane %v336_v34, 2 }
  0x27   :  { %v338_v36 = vadd.f32 %v337_v35, %v336_v34 }
  0x29   :  { %75 = vxpose.xlu0.b32.cont [6/7] (short) %v52_v9, 128  ;;  %v339_v37 = vrot.slane %v338_v36, 1 }
  0x2b   :  { %v340_v38 = vadd.f32 %v339_v37, %v338_v36 }
  0x2d   :  { %76 = vxpose.xlu0.b32.end [7/7] (short) %v53_v14, 128  ;;  %v341_v40 = vadd.f32 %v340_v38, %v328_v39 }
  0x2f   :  { %342 = vst [vmem:[#allocation6] sm:$0x1] %v341_v40 }
  0x95   :  { %v86_v17 = vpop.trf.xlu0 }
  0x96   :  { %427 = vmatprep.mubr.msk.f32.mxu0 %vm102_vm0, %v86_v17 }
  0x99   :  { %v87_v18 = vpop.trf.xlu0 }
  0x9a   :  { %428 = vmatmul.mubr.msk.f32.vlgmr.msra.gmra.mrb[0].mxu0 %vm102_vm0, %v87_v18 }
  0x9d   :  { %v88_v19 = vpop.trf.xlu0 }
  0x9e   :  { %430 = vmatprep.mubr.msk.f32.mxu0 %vm102_vm0, %v88_v19 }
  0xa1   :  { %v89_v20 = vpop.trf.xlu0 }
  0xa2   :  { %431 = vmatmul.mubr.msk.f32.gmra.mrb[2].mxu0 %vm102_vm0, %v89_v20 }
  0xa5   :  { %v90_v21 = vpop.trf.xlu0 }
  0xa6   :  { %433 = vmatprep.mubr.msk.f32.mxu0 %vm102_vm0, %v90_v21 }
  0xa9   :  { %v91_v22 = vpop.trf.xlu0 }
  0xaa   :  { %434 = vmatmul.mubr.msk.f32.gmra.mrb[4].mxu0 %vm102_vm0, %v91_v22 }
  0xad   :  { %v92_v23 = vpop.trf.xlu0 }
  0xae   :  { %436 = vmatprep.mubr.msk.f32.mxu0 %vm102_vm0, %v92_v23 }
  0xb1   :  { %v93_v24 = vpop.trf.xlu0 }
  0xb2   :  { %437 = vmatmul.mubr.msk.f32.gmra.mrb[6].mxu0 %vm102_vm0, %v93_v24 }
  0xb5   :  { %v94_v25 = vpop.trf.xlu0 }
  0xb6   :  { %439 = vmatprep.mubr.msk.f32.mxu1 %vm102_vm0, %v94_v25 }
  0xb9   :  { %v95_v26 = vpop.trf.xlu0 }
  0xba   :  { %440 = vmatmul.mubr.msk.f32.vlgmr.msra.gmra.mrb[0].mxu1 %vm102_vm0, %v95_v26 }
  0xbd   :  { %v96_v27 = vpop.trf.xlu0 }
  0xbe   :  { %442 = vmatprep.mubr.msk.f32.mxu1 %vm102_vm0, %v96_v27 }
  0xc1   :  { %v97_v28 = vpop.trf.xlu0 }
  0xc2   :  { %443 = vmatmul.mubr.msk.f32.gmra.mrb[2].mxu1 %vm102_vm0, %v97_v28 }
  0xc5   :  { %v98_v29 = vpop.trf.xlu0 }
  0xc6   :  { %445 = vmatprep.mubr.msk.f32.mxu1 %vm102_vm0, %v98_v29 }
  0xc9   :  { %v99_v30 = vpop.trf.xlu0 }
  0xca   :  { %446 = vmatmul.mubr.msk.f32.gmra.mrb[4].mxu1 %vm102_vm0, %v99_v30 }
  0xcd   :  { %v100_v31 = vpop.trf.xlu0 }
  0xce   :  { %448 = vmatprep.mubr.msk.f32.mxu1 %vm102_vm0, %v100_v31 }
  0xd1   :  { %v101_v32 = vpop.trf.xlu0 }
  0xd2   :  { %449 = vmatmul.mubr.msk.f32.gmra.mrb[6].mxu1 %vm102_vm0, %v101_v32 }
  0xd3   :  { %510 = shalt.err (!%p507_p12)
}
  0xd4   :  { %s511_s28 = scalar_lea.hbm %s630_s2, 16 }
  0xd5   :  { %p512_p13 = scmp.ne.s32.totalorder %s630_s2, %s511_s28  ;;  %p515_p0 = scmp.lt.u32.totalorder %s511_s28, %s630_s2 }
  0xd7   :  { %p517_p1 = pnand %p515_p0, %p512_p13 }
  0xd9   :  { %520 = shalt.err (!%p517_p1)
}
  0xda   :  { %364 = dma.vmem_to_hbm [thread:$0]  %s362_s23, 16, %s630_s2, [#allocation7]  }
  0xdb   :  { %s554_s2 = smov [#allocation5]  }
  0xdc   :  { %s348_s7 = sshll.u32 %s554_s2, 4  ;;  %s349_s7 = int_to_ptr.vmem [resolvable:$true] %s348_s7 }
  0xdd   :  { %s521_s8 = scalar_lea.vmem %s349_s7, 2048  ;;  %p526_p3 = scmp.lt.s32.totalorder %s349_s7, %s349_s7 }
  0xde   :  { %p522_p2 = scmp.ne.s32.totalorder %s349_s7, %s521_s8  ;;  %p527_p4 = scmp.lt.s32.totalorder %s521_s8, %s521_s8 }
  0xe0   :  { %p528_p5 = por %p527_p4, %p526_p3 }
  0xe2   :  { %p529_p6 = pnand %p528_p5, %p522_p2 }
 0x16d   :  { %v429_v41 = vpop.f32.mrb[0].mxu0 }
 0x16e   :  { %v217_v42 = vpop.f32.mrb[1].mxu0  ;;  %313 = vst [vmem:[#allocation5 + $0x8] sm:$0xff] %v429_v41 }
 0x16f   :  { %312 = vst [vmem:[#allocation5] sm:$0xff] %v217_v42 }
 0x175   :  { %v432_v43 = vpop.f32.mrb[2].mxu0 }
 0x176   :  { %v227_v44 = vpop.f32.mrb[3].mxu0  ;;  %315 = vst [vmem:[#allocation5 + $0x18] sm:$0xff] %v432_v43 }
 0x177   :  { %314 = vst [vmem:[#allocation5 + $0x10] sm:$0xff] %v227_v44 }
 0x17d   :  { %v435_v45 = vpop.f32.mrb[4].mxu0 }
 0x17e   :  { %v237_v46 = vpop.f32.mrb[5].mxu0  ;;  %317 = vst [vmem:[#allocation5 + $0x28] sm:$0xff] %v435_v45 }
 0x17f   :  { %316 = vst [vmem:[#allocation5 + $0x20] sm:$0xff] %v237_v46 }
 0x185   :  { %v438_v47 = vpop.f32.mrb[6].mxu0 }
 0x186   :  { %v247_v48 = vpop.f32.mrb[7].mxu0  ;;  %319 = vst [vmem:[#allocation5 + $0x38] sm:$0xff] %v438_v47 }
 0x187   :  { %318 = vst [vmem:[#allocation5 + $0x30] sm:$0xff] %v247_v48 }
 0x18d   :  { %v441_v49 = vpop.f32.mrb[0].mxu1 }
 0x18e   :  { %v257_v50 = vpop.f32.mrb[1].mxu1  ;;  %321 = vst [vmem:[#allocation5 + $0x48] sm:$0xff] %v441_v49 }
 0x18f   :  { %320 = vst [vmem:[#allocation5 + $0x40] sm:$0xff] %v257_v50 }
 0x195   :  { %v444_v51 = vpop.f32.mrb[2].mxu1 }
 0x196   :  { %v267_v52 = vpop.f32.mrb[3].mxu1  ;;  %323 = vst [vmem:[#allocation5 + $0x58] sm:$0xff] %v444_v51 }
 0x197   :  { %322 = vst [vmem:[#allocation5 + $0x50] sm:$0xff] %v267_v52 }
 0x19d   :  { %v447_v53 = vpop.f32.mrb[4].mxu1 }
 0x19e   :  { %v277_v54 = vpop.f32.mrb[5].mxu1  ;;  %325 = vst [vmem:[#allocation5 + $0x68] sm:$0xff] %v447_v53 }
 0x19f   :  { %324 = vst [vmem:[#allocation5 + $0x60] sm:$0xff] %v277_v54 }
 0x1a5   :  { %v450_v55 = vpop.f32.mrb[6].mxu1 }
 0x1a6   :  { %v287_v56 = vpop.f32.mrb[7].mxu1  ;;  %327 = vst [vmem:[#allocation5 + $0x78] sm:$0xff] %v450_v55 }
 0x1a7   :  { %326 = vst [vmem:[#allocation5 + $0x70] sm:$0xff] %v287_v56 }
 0x1a8   :  { %532 = shalt.err (!%p529_p6)
}
 0x1a9   :  { %s533_s11 = scalar_lea.hbm %s629_s1, 2048 }
 0x1aa   :  { %p534_p7 = scmp.ne.s32.totalorder %s629_s1, %s533_s11  ;;  %p537_p8 = scmp.lt.u32.totalorder %s533_s11, %s629_s1 }
 0x1ac   :  { %p539_p9 = pnand %p537_p8, %p534_p7 }
 0x1ae   :  { %542 = shalt.err (!%p539_p9)
}
 0x1af   :  { %354 = dma.vmem_to_hbm [thread:$0]  %s349_s7, 2048, %s629_s1, [#allocation4], %s550_s19, %s550_s19, %s551_s20  }
 0x1b0   :  { %545 = dma.done.wait [#allocation4], 2048  }
 0x1b1   :  { %546 = vsyncadd [#allocation4], 4294965248 }
 0x1b2   :  { %547 = dma.done.wait [#allocation7], 16  }
 0x1b3   :  { %548 = vsyncadd [#allocation7], 4294967280 }
 0x1b4   :  { %371 = vsyncpa [#allocation3], 1 }
 0x1b5   :  { %372 = vsyncpa [#allocation4], 1 }
 0x1b6   :  { %373 = vsyncpa [#allocation7], 1 }

</bundles_post_ra>
